<compile_context>
chip_gen: v6e
topology: v6e:2x2x1
jax: 0.10.0
libtpu: 0.0.40
codegen_flags: <defaults>
</compile_context>

<pallas_src>
import functools

import jax
import jax.numpy as jnp
from jax.experimental import pallas as pl
from jax.experimental.pallas import tpu as pltpu


def _round_up(x: int, m: int) -> int:
    return ((x + m - 1) // m) * m


def _cls_head_kernel(x_ref, w1_ref, b1_ref, w2_ref, b2_ref, out_ref, *, n_chunks):
    # x:  [TM, H] f32       w1: [H, H]  compute dtype     b1: [1, H]  f32
    # w2: [H, Lp] compute   b2: [1, Lp] f32               out: [TM, Lp]
    tm = x_ref.shape[0]
    cm = tm // n_chunks
    w1 = w1_ref[...]
    w2 = w2_ref[...]
    b1 = b1_ref[...]
    b2 = b2_ref[...]
    # Static sub-chunk loop: matmuls of chunk j+1 (MXU slot) overlap the tanh
    # drain of chunk j (EUP slot).
    for j in range(n_chunks):
        sl = pl.ds(j * cm, cm)
        xs = x_ref[sl, :].astype(w1.dtype)            # f32 load, bf16 cast on VPU
        h = jnp.dot(xs, w1, preferred_element_type=jnp.float32) + b1
        # TODO(synk): training-mode dropout (p=0.1) omitted — identity at inference.
        h = jnp.tanh(h.astype(w2.dtype))              # bf16 tanh on v6e/v7x EUP
        logits = jnp.dot(h, w2, preferred_element_type=jnp.float32) + b2
        out_ref[sl, :] = logits.astype(out_ref.dtype)


def prepare_params(w1, b1, w2, b2, *, compute_dtype=jnp.bfloat16):
    """One-time weight prep, hoisted out of the per-call hot path."""
    H = w1.shape[0]
    L = w2.shape[1]
    l_pad = _round_up(max(L, 1), 128)                 # lane-dense output block
    w1_c = w1.astype(compute_dtype)
    w2_p = jnp.pad(w2, ((0, 0), (0, l_pad - L))).astype(compute_dtype)
    b1_2d = b1.reshape(1, H).astype(jnp.float32)
    b2_2d = jnp.pad(b2, (0, l_pad - L)).reshape(1, l_pad).astype(jnp.float32)
    return w1_c, b1_2d, w2_p, b2_2d


def _pick_tm(batch: int, block_m: int) -> int:
    """Batch-tile rows.  32-aligned (bf16 sublane pack x 2 sub-chunks); split
    moderate batches into two tiles so both v7x TensorCores are fed."""
    if batch <= 8:
        return 8
    if batch <= 16:
        return 16
    if batch <= 32:
        return 32
    b32 = _round_up(batch, 32)
    if b32 <= 2 * block_m:
        return _round_up((b32 + 1) // 2, 32)
    return _round_up(block_m, 32)


@functools.partial(jax.jit, static_argnames=("num_labels", "block_m"))
def classification_head_apply(x, w1_c, b1_2d, w2_p, b2_2d, *, num_labels,
                              block_m=256):
    """x: [B, H] float; prepared params from prepare_params() -> [B, num_labels]."""
    B, H = x.shape
    l_pad = w2_p.shape[1]
    assert w1_c.shape == (H, H) and w2_p.shape[0] == H and l_pad % 128 == 0

    tm = _pick_tm(B, block_m)
    grid_m = pl.cdiv(B, tm)
    n_chunks = 2 if (tm % 32 == 0 and tm >= 64) else 1

    # --- VMEM budget (generation aware) ---
    cb = jnp.dtype(w1_c.dtype).itemsize
    xb = jnp.dtype(x.dtype).itemsize
    resident = H * H * cb + H * l_pad * cb + (H + l_pad) * 4       # single-buffered
    per_tile = tm * H * xb + tm * l_pad * xb                       # double-buffered
    need = resident + 2 * per_tile + (2 << 20)
    try:
        vmem_cap = pltpu.get_tpu_info().vmem_capacity_bytes
    except Exception:  # conservative fallback (v7x-sized)
        vmem_cap = 64 << 20
    budget = vmem_cap - (8 << 20)                                  # Mosaic headroom
    if need > budget:
        # TODO(synk): add a K-reduction grid axis over H (f32 accumulator
        # scratch + pl.when init/finalize) for resident weights > VMEM.
        raise NotImplementedError(
            f"hidden_size={H}: resident weights + tiles ({need} B) exceed the "
            f"VMEM budget ({budget} B); K-tiled variant not implemented")
    vmem_limit = int(min(max(need + (4 << 20), 16 << 20), budget))

    out = pl.pallas_call(
        functools.partial(_cls_head_kernel, n_chunks=n_chunks),
        out_shape=jax.ShapeDtypeStruct((B, l_pad), x.dtype),
        grid_spec=pltpu.PrefetchScalarGridSpec(
            num_scalar_prefetch=0,
            grid=(grid_m,),
            in_specs=[
                # x tile: pipelined (double-buffered), read as f32, cast in-kernel.
                pl.BlockSpec((tm, H), lambda i: (i, 0)),
                # Weights / biases: resident, revisited every step -> 1 buffer.
                pl.BlockSpec((H, H), lambda i: (0, 0),
                             pipeline_mode=pl.Buffered(1)),
                pl.BlockSpec((1, H), lambda i: (0, 0),
                             pipeline_mode=pl.Buffered(1)),
                pl.BlockSpec((H, l_pad), lambda i: (0, 0),
                             pipeline_mode=pl.Buffered(1)),
                pl.BlockSpec((1, l_pad), lambda i: (0, 0),
                             pipeline_mode=pl.Buffered(1)),
            ],
            out_specs=pl.BlockSpec((tm, l_pad), lambda i: (i, 0)),
        ),
        compiler_params=pltpu.CompilerParams(
            dimension_semantics=("parallel",),
            vmem_limit_bytes=vmem_limit,
        ),
    )(x, w1_c, b1_2d, w2_p, b2_2d)

    # Ragged last-block rows / padded label lanes are discarded here; do not
    # reduce across the padded axes upstream of this slice.
    return out[:B, :num_labels]


def classification_head(x, w1, b1, w2, b2, *, block_m=256,
                        compute_dtype=jnp.bfloat16):
    """One-shot convenience wrapper.  In hot loops call prepare_params() once
    and reuse it with classification_head_apply()."""
    params = prepare_params(w1, b1, w2, b2, compute_dtype=compute_dtype)
    return classification_head_apply(x, *params, num_labels=w2.shape[1],
                                     block_m=block_m)


def _reference_matched(x, w1, b1, w2, b2, compute_dtype=jnp.bfloat16):
    """Reference with the same bf16 MXU operands / bf16 tanh / f32 accumulation."""
    h = jnp.dot(x.astype(compute_dtype), w1.astype(compute_dtype),
                preferred_element_type=jnp.float32) + b1.astype(jnp.float32)
    h = jnp.tanh(h.astype(compute_dtype))
    logits = jnp.dot(h, w2.astype(compute_dtype),
                     preferred_element_type=jnp.float32) + b2.astype(jnp.float32)
    return logits.astype(x.dtype)


def _reference_f32(x, w1, b1, w2, b2):
    h = jnp.tanh(x @ w1 + b1)
    return h @ w2 + b2


def _make_params(key, hidden, num_labels):
    kx, kw1, kb1, kw2, kb2 = jax.random.split(key, 5)
    bound = 1.0 / (hidden ** 0.5)
    w1 = jax.random.uniform(kw1, (hidden, hidden), minval=-bound, maxval=bound,
                            dtype=jnp.float32)
    b1 = jax.random.uniform(kb1, (hidden,), minval=-bound, maxval=bound,
                            dtype=jnp.float32)
    w2 = jax.random.uniform(kw2, (hidden, num_labels), minval=-bound, maxval=bound,
                            dtype=jnp.float32)
    b2 = jax.random.uniform(kb2, (num_labels,), minval=-bound, maxval=bound,
                            dtype=jnp.float32)
    return kx, w1, b1, w2, b2


if __name__ == "__main__":
    key = jax.random.PRNGKey(0)
    k_small, k_big = jax.random.split(key)

    # Config 1: nominal small shapes (single grid step, single sub-chunk).
    batch, hidden, num_labels = 8, 32, 4
    kx, w1, b1, w2, b2 = _make_params(k_small, hidden, num_labels)
    x = jax.random.normal(kx, (batch, hidden), dtype=jnp.float32)

    params = prepare_params(w1, b1, w2, b2)            # hoisted one-time prep
    logits = classification_head_apply(x, *params, num_labels=num_labels)
    jax.block_until_ready(logits)
    assert logits.shape == (batch, num_labels)
    assert jnp.allclose(logits, _reference_matched(x, w1, b1, w2, b2),
                        atol=2e-2, rtol=2e-2), "mismatch vs matched ref"
    assert jnp.allclose(logits, _reference_f32(x, w1, b1, w2, b2),
                        atol=5e-2, rtol=5e-2), "mismatch vs f32 ref"

    # Config 2: exercises batch tiling (grid=2, ragged last block, sub-chunking).
    batch2, hidden2, num_labels2 = 200, 256, 4
    kx2, w1b, b1b, w2b, b2b = _make_params(k_big, hidden2, num_labels2)
    x2 = jax.random.normal(kx2, (batch2, hidden2), dtype=jnp.float32)

    params2 = prepare_params(w1b, b1b, w2b, b2b)
    logits2 = classification_head_apply(x2, *params2, num_labels=num_labels2)
    jax.block_until_ready(logits2)
    assert logits2.shape == (batch2, num_labels2)
    assert jnp.allclose(logits2, _reference_matched(x2, w1b, b1b, w2b, b2b),
                        atol=2e-2, rtol=2e-2), "mismatch vs matched ref (tiled)"
    assert jnp.allclose(logits2, _reference_f32(x2, w1b, b1b, w2b, b2b),
                        atol=5e-2, rtol=5e-2), "mismatch vs f32 ref (tiled)"

    # One-shot convenience wrapper agrees with the hoisted path.
    logits3 = classification_head(x, w1, b1, w2, b2)
    jax.block_until_ready(logits3)
    assert jnp.allclose(logits3, logits, atol=1e-6)

    print("KERNEL_OK")
</pallas_src>

<mosaic_0001>
module attributes {stable_mosaic.version = 11 : i64} {
  func.func @_cls_head_kernel(%arg0: i32, %arg1: memref<8x32xf32, #tpu.memory_space<vmem>>, %arg2: memref<32x32xbf16, #tpu.memory_space<vmem>>, %arg3: memref<1x32xf32, #tpu.memory_space<vmem>>, %arg4: memref<32x128xbf16, #tpu.memory_space<vmem>>, %arg5: memref<1x128xf32, #tpu.memory_space<vmem>>, %arg6: memref<8x128xf32, #tpu.memory_space<vmem>>) attributes {dimension_semantics = [#tpu.dimension_semantics<parallel>], iteration_bounds = array<i64: 1>, scalar_prefetch = 0 : i64, scratch_operands = 0 : i64, tpu.core_type = #tpu.core_type<tc>, window_params = [{transform_indices = @transform_0, window_bounds = array<i64: 8, 32>}, {pipeline_mode = #tpu.pipeline_mode<synchronous>, transform_indices = @transform_1, window_bounds = array<i64: 32, 32>}, {pipeline_mode = #tpu.pipeline_mode<synchronous>, transform_indices = @transform_2, window_bounds = array<i64: 1, 32>}, {pipeline_mode = #tpu.pipeline_mode<synchronous>, transform_indices = @transform_3, window_bounds = array<i64: 32, 128>}, {pipeline_mode = #tpu.pipeline_mode<synchronous>, transform_indices = @transform_4, window_bounds = array<i64: 1, 128>}, {transform_indices = @transform_5, window_bounds = array<i64: 8, 128>}]} {
    %c0 = arith.constant 0 : index
    %c0_0 = arith.constant 0 : index
    %0 = vector.load %arg2[%c0, %c0_0] : memref<32x32xbf16, #tpu.memory_space<vmem>>, vector<32x32xbf16>
    %c0_1 = arith.constant 0 : index
    %c0_2 = arith.constant 0 : index
    %1 = vector.load %arg4[%c0_1, %c0_2] : memref<32x128xbf16, #tpu.memory_space<vmem>>, vector<32x128xbf16>
    %c0_3 = arith.constant 0 : index
    %c0_4 = arith.constant 0 : index
    %2 = vector.load %arg3[%c0_3, %c0_4] : memref<1x32xf32, #tpu.memory_space<vmem>>, vector<1x32xf32>
    %c0_5 = arith.constant 0 : index
    %c0_6 = arith.constant 0 : index
    %3 = vector.load %arg5[%c0_5, %c0_6] : memref<1x128xf32, #tpu.memory_space<vmem>>, vector<1x128xf32>
    %c0_7 = arith.constant 0 : index
    %c0_8 = arith.constant 0 : index
    %4 = vector.load %arg1[%c0_7, %c0_8] : memref<8x32xf32, #tpu.memory_space<vmem>>, vector<8x32xf32>
    %5 = arith.truncf %4 : vector<8x32xf32> to vector<8x32xbf16>
    %cst = arith.constant dense<0.000000e+00> : vector<8x32xf32>
    %6 = tpu.matmul %5, %0, %cst {dimension_numbers = #tpu.dot_dimension_numbers<[1], [0], [0], [1], [0, 0, 1, 1], [], []>} : vector<8x32xbf16>, vector<32x32xbf16>, vector<8x32xf32> -> vector<8x32xf32>
    %7 = vector.broadcast %2 : vector<1x32xf32> to vector<8x32xf32>
    %8 = arith.addf %6, %7 : vector<8x32xf32>
    %9 = arith.truncf %8 : vector<8x32xf32> to vector<8x32xbf16>
    %10 = math.tanh %9 : vector<8x32xbf16>
    %cst_9 = arith.constant dense<0.000000e+00> : vector<8x128xf32>
    %11 = tpu.matmul %10, %1, %cst_9 {dimension_numbers = #tpu.dot_dimension_numbers<[1], [0], [0], [1], [0, 0, 1, 1], [], []>} : vector<8x32xbf16>, vector<32x128xbf16>, vector<8x128xf32> -> vector<8x128xf32>
    %12 = vector.broadcast %3 : vector<1x128xf32> to vector<8x128xf32>
    %13 = arith.addf %11, %12 : vector<8x128xf32>
    %c0_10 = arith.constant 0 : index
    %c0_11 = arith.constant 0 : index
    %14 = vector.load %arg6[%c0_10, %c0_11] : memref<8x128xf32, #tpu.memory_space<vmem>>, vector<8x128xf32>
    tpu.vector_store %arg6[%c0_10, %c0_11], %13 {strides = array<i32>} : memref<8x128xf32, #tpu.memory_space<vmem>>, vector<8x128xf32>,
    return
  }
  func.func @transform_0(%arg0: i32) -> (i32, i32) {
    %c0_i32 = arith.constant 0 : i32
    %c0_i32_0 = arith.constant 0 : i32
    return %arg0, %c0_i32 : i32, i32
  }
  func.func @transform_1(%arg0: i32) -> (i32, i32) {
    %c0_i32 = arith.constant 0 : i32
    %c0_i32_0 = arith.constant 0 : i32
    %c0_i32_1 = arith.constant 0 : i32
    return %c0_i32, %c0_i32_0 : i32, i32
  }
  func.func @transform_2(%arg0: i32) -> (i32, i32) {
    %c0_i32 = arith.constant 0 : i32
    %c0_i32_0 = arith.constant 0 : i32
    %c0_i32_1 = arith.constant 0 : i32
    return %c0_i32, %c0_i32_0 : i32, i32
  }
  func.func @transform_3(%arg0: i32) -> (i32, i32) {
    %c0_i32 = arith.constant 0 : i32
    %c0_i32_0 = arith.constant 0 : i32
    %c0_i32_1 = arith.constant 0 : i32
    return %c0_i32, %c0_i32_0 : i32, i32
  }
  func.func @transform_4(%arg0: i32) -> (i32, i32) {
    %c0_i32 = arith.constant 0 : i32
    %c0_i32_0 = arith.constant 0 : i32
    %c0_i32_1 = arith.constant 0 : i32
    return %c0_i32, %c0_i32_0 : i32, i32
  }
  func.func @transform_5(%arg0: i32) -> (i32, i32) {
    %c0_i32 = arith.constant 0 : i32
    %c0_i32_0 = arith.constant 0 : i32
    return %arg0, %c0_i32 : i32, i32
  }
}

</mosaic_0001>

<bundles_post_ra>
// kernel: classification_head_apply.1
= control target key start
LH: loop header
LB: loop body
LE: loop exit
PB: predicated region body
PF: predicated region fallthrough
CT: control target
= control target key end

     0   :  { %10 = vsyncpa [#allocation3], 0  ;;  %s368_s0 = inlined_call_operand.hbm [shape: f32[8,32], index: 0, kind: input, shape index: {}]   ;;  %s369_s1 = inlined_call_operand.hbm [shape: bf16[32,32], index: 1, kind: input, shape index: {}]   ;;  %s370_s2 = inlined_call_operand.vmem [shape: f32[1,32], index: 2, kind: input, shape index: {}]   ;;  %s371_s3 = inlined_call_operand.hbm [shape: bf16[32,128], index: 3, kind: input, shape index: {}]   ;;  %s372_s4 = inlined_call_operand.vmem [shape: f32[1,128], index: 4, kind: input, shape index: {}]   ;;  %s373_s5 = inlined_call_operand.vmem [shape: f32[8,128], index: 5, kind: output, shape index: {}]  }
   0x1   :  { %11 = vsyncpa [#allocation5], 0  ;;  %s311_s18 = smov [#allocation4]  }
   0x2   :  { %s27_s19 = sshll.u32 %s311_s18, 4  ;;  %s28_s19 = int_to_ptr.vmem [resolvable:$true] %s27_s19 }
   0x3   :  { %s255_s20 = scalar_lea.vmem %s28_s19, 256  ;;  %p260_p1 = scmp.lt.s32.totalorder %s28_s19, %s28_s19 }
   0x4   :  { %p256_p0 = scmp.ne.s32.totalorder %s28_s19, %s255_s20  ;;  %p261_p2 = scmp.lt.s32.totalorder %s255_s20, %s255_s20 }
   0x6   :  { %p262_p3 = por %p261_p2, %p260_p1 }
   0x8   :  { %p263_p4 = pnand %p262_p3, %p256_p0 }
   0xa   :  { %266 = shalt.err (!%p263_p4)
}
   0xb   :  { %s312_s21 = smov 64   ;;  %s313_s22 = smov 4  }
   0xc   :  { %33 = dma.hbm_to_vmem [thread:$0]  %s369_s1, 256, %s28_s19, [#allocation5], %s312_s21, %s312_s21, %s313_s22  }
   0xd   :  { %s314_s25 = smov [#allocation2]   ;;  %s315_s27 = smov [#allocation6]  }
   0xe   :  { %s18_s26 = sshll.u32 %s314_s25, 4  ;;  %s41_s28 = sshll.u32 %s315_s27, 4  ;;  %s19_s26 = int_to_ptr.vmem [resolvable:$true] %s18_s26  ;;  %s42_s28 = int_to_ptr.vmem [resolvable:$true] %s41_s28 }
   0xf   :  { %s275_s29 = scalar_lea.vmem %s19_s26, 128  ;;  %p280_p6 = scmp.lt.s32.totalorder %s19_s26, %s19_s26 }
  0x10   :  { %p276_p5 = scmp.ne.s32.totalorder %s19_s26, %s275_s29  ;;  %p281_p7 = scmp.lt.s32.totalorder %s275_s29, %s275_s29 }
  0x12   :  { %p282_p8 = por %p281_p7, %p280_p6 }
  0x14   :  { %p283_p9 = pnand %p282_p8, %p276_p5 }
  0x16   :  { %286 = shalt.err (!%p283_p9)
}
  0x17   :  { %21 = dma.hbm_to_vmem [thread:$0]  %s368_s0, 128, %s19_s26, [#allocation3]  }
  0x18   :  { %s295_s7 = scalar_lea.vmem %s42_s28, 256  ;;  %p300_p11 = scmp.lt.s32.totalorder %s42_s28, %s42_s28 }
  0x19   :  { %p296_p10 = scmp.ne.s32.totalorder %s42_s28, %s295_s7  ;;  %p301_p12 = scmp.lt.s32.totalorder %s295_s7, %s295_s7 }
  0x1b   :  { %p302_p13 = por %p301_p12, %p300_p11 }
  0x1d   :  { %p303_p0 = pnand %p302_p13, %p296_p10 }
  0x1f   :  { %306 = shalt.err (!%p303_p0)
}
  0x20   :  { %47 = dma.hbm_to_vmem [thread:$0]  %s371_s3, 256, %s42_s28, [#allocation5], %s312_s21, %s312_s21, %s313_s22  }
  0x21   :  { %307 = dma.done.wait [#allocation3], 128  }
  0x22   :  { %308 = vsyncadd [#allocation3], 4294967168 }
  0x23   :  { %309 = dma.done.wait [#allocation5], 512  }
  0x24   :  { %310 = vsyncadd [#allocation5], 4294966784  ;;  %v316_v0 = vmov 0.0   ;;  %vm317_vm0 = vmmov 0   ;;  %v241_v1 = vld [vmem:[#allocation4 + $0x8] sm:$0xff]   ;;  %v242_v2 = vld [vmem:[#allocation4] sm:$0xff]  }
  0x25   :  { %218 = vmatprep.subr.bf16.mxu0 %v316_v0  ;;  %222 = vmatprep.mubr.msk.bf16.mxu0 %vm317_vm0, %v316_v0  ;;  %v70_v3 = vld [vmem:[#allocation2] sm:$0xff]  ;;  %vm90_vm1 = vcmask 261120   ;;  %v244_v6 = vld [vmem:[#allocation6] sm:$0xff]  }
  0x26   :  { %226 = vmatprep.subr.bf16.mxu1 %v316_v0  ;;  %230 = vmatprep.mubr.msk.bf16.mxu1 %vm317_vm0, %v316_v0  ;;  %v71_v4 = vpack.c.bf16 %v70_v3, %v70_v3  ;;  %v243_v5 = vld [vmem:[#allocation6 + $0x8] sm:$0xff]  }
  0x27   :  { %219 = vmatpush3.bf16.msra.mxu0 %v241_v1  ;;  %227 = vmatpush3.bf16.msra.mxu1 %v243_v5  ;;  %v204_v7 = vld [vmem:[%s370_s2] ss:$0 sm:$0xff] }
  0x28   :  { %220 = vmatprep.subr.bf16.mxu0 %v316_v0  ;;  %228 = vmatprep.subr.bf16.mxu1 %v316_v0  ;;  %v208_v15 = vld [vmem:[%s372_s4] ss:$0 sm:$0xff] }
  0x2b   :  { %221 = vmatpush3.bf16.msra.mxu0 %v242_v2  ;;  %229 = vmatpush3.bf16.msra.mxu1 %v244_v6 }
  0x2e   :  { %223 = vmatmul.mubr.msk.bf16.vlgmr.msra.gmra.mxu0 %vm90_vm1, %v71_v4 }
  0xee   :  { %v128_v8 = vpop.f32.mrf.mxu0 }
  0xef   :  { %v129_v9 = vadd.f32 %v204_v7, %v128_v8 }
  0xf0   :  { %v224_v10 = vpop.f32.mrf.mxu0 }
  0xf1   :  { %v134_v11 = vpack.c.bf16 %v129_v9, %v129_v9 }
  0xf2   :  { %v131_v12 = vpop.f32.mrf.mxu0 }
  0xf3   :  { %245 = vtanh.bf16 %v134_v11 }
  0xf4   :  { %v225_v13 = vpop.f32.mrf.mxu0 }
 0x101   :  { %v246_v14 = vpop.eup %245 }
 0x102   :  { %231 = vmatmul.mubr.msk.bf16.vlgmr.msra.gmra.mxu1 %vm90_vm1, %v246_v14 }
 0x1c2   :  { %v191_v16 = vpop.f32.mrf.mxu1 }
 0x1c3   :  { %v192_v17 = vadd.f32 %v208_v15, %v191_v16 }
 0x1c4   :  { %v232_v18 = vpop.f32.mrf.mxu1 }
 0x1c5   :  { %197 = vst [vmem:[%s373_s5] sm:$0xff] %v192_v17 }
 0x1c6   :  { %v194_v19 = vpop.f32.mrf.mxu1 }
 0x1c8   :  { %v233_v20 = vpop.f32.mrf.mxu1 }
 0x1c9   :  { %202 = vsyncpa [#allocation3], 1 }
 0x1ca   :  { %203 = vsyncpa [#allocation5], 1 }

</bundles_post_ra>
